<compile_context>
chip_gen: v7x
topology: tpu7x:2x2x1
jax: 0.10.0
libtpu: 0.0.40
codegen_flags: <defaults>
</compile_context>

<pallas_src>
import functools

import jax
import jax.numpy as jnp
from jax import lax
from jax.experimental import pallas as pl
from jax.experimental.pallas import tpu as pltpu

# ---- module hyper-parameters (args) ------------------------------------------
NUM_FEATURES = 4        # in_channels of conv1
NUM_ASSETS   = 16       # per-asset width (W axis)
SEQ_LEN      = 8        # H axis (args.seq_len)
CONV_DIM     = 4        # args.conv_dim
LIN          = 16       # hidden width of linear_state1 / linear_action
BATCH        = 2

K1 = 3                  # conv1 kernel height
K2 = SEQ_LEN - 2        # conv2 kernel height
H1 = SEQ_LEN - K1 + 1   # conv1 output height (== K2, so conv2 output height == 1)

X_FLAT  = NUM_FEATURES * SEQ_LEN * NUM_ASSETS      # 512
Y1_FLAT = 2 * H1 * NUM_ASSETS                      # 192
Y2_FLAT = CONV_DIM * NUM_ASSETS                    # 64


# ---- the Pallas kernel ---------------------------------------------------------
def _critic_kernel(x_ref, a1_ref, act_ref,
                   e1_ref, b1_ref, e2_ref, b2_ref,
                   wt_ref, wm_ref, wb_ref, bbig_ref,
                   wq_ref, bq_ref, out_ref):
    f32 = jnp.float32
    bf16 = jnp.bfloat16

    # conv1 + ReLU as one MXU matmul over the im2col-expanded weight table.
    # bf16 operands, f32 accumulate; bias add / ReLU stay f32 (v5e VPU has no bf16).
    y1 = jnp.maximum(
        jnp.dot(x_ref[...].astype(bf16), e1_ref[...],
                preferred_element_type=f32) + b1_ref[...], 0.0)        # (bb, 192)

    # conv2 + ReLU.
    y2 = jnp.maximum(
        jnp.dot(y1.astype(bf16), e2_ref[...],
                preferred_element_type=f32) + b2_ref[...], 0.0)        # (bb, 64)

    # conv3 (1x1) . linear_state1 fused with linear_action: three small matmuls
    # summed before the shared ReLU.  No concat, no zero lanes anywhere.
    h = jnp.dot(y2.astype(bf16), wt_ref[...], preferred_element_type=f32)
    h += jnp.dot(a1_ref[...].astype(bf16), wm_ref[...], preferred_element_type=f32)
    h += jnp.dot(act_ref[...].astype(bf16), wb_ref[...], preferred_element_type=f32)
    h = jnp.maximum(h + bbig_ref[...], 0.0)                            # (bb, 16)

    # linear_q (N=1): VPU multiply + lane reduction (f32) instead of another MXU trip.
    q = jnp.sum(h * wq_ref[...], axis=-1, keepdims=True) + bq_ref[...]
    out_ref[...] = q                                                   # (bb, 1)


# ---- wrapper -------------------------------------------------------------------
def _round_up(x, m):
    return ((x + m - 1) // m) * m


@functools.partial(jax.jit, static_argnames=("block_batch",))
def critic_forward(kparams, state_x, state_a1, action, block_batch=1024):
    """Batched CriticNetwork2.forward; returns q of shape (B,)."""
    B = state_x.shape[0]
    block_batch = max(8, _round_up(block_batch, 8))          # guard: multiple of 8
    # >= 2 grid blocks whenever B allows it (both v7x TensorCores get work), capped
    # at block_batch so the tile fits the scoped-VMEM defaults on all chips.
    bb = min(block_batch, max(8, _round_up(-(-B // 2), 8)))

    # Layout plumbing: flatten each NCHW sample to 512 lanes.  No full-batch pad:
    # only a sub-8-row pad when B % 8 != 0 (for B % 8 == 0 nothing is copied).
    x = state_x.reshape(B, X_FLAT)
    a1, act = state_a1, action
    b_pad = _round_up(B, 8)
    if b_pad != B:
        pad = ((0, b_pad - B), (0, 0))
        x, a1, act = jnp.pad(x, pad), jnp.pad(a1, pad), jnp.pad(act, pad)

    grid = (pl.cdiv(b_pad, bb),)          # ragged final block: OOB rows discarded

    row = lambda w: pl.BlockSpec((bb, w), lambda i: (i, 0))
    const = lambda a: pl.BlockSpec(a.shape, lambda i: (0, 0))   # block-invariant

    out = pl.pallas_call(
        _critic_kernel,
        out_shape=jax.ShapeDtypeStruct((b_pad, 1), jnp.float32),
        grid=grid,
        in_specs=[
            row(X_FLAT), row(NUM_ASSETS), row(NUM_ASSETS),
            const(kparams["e1"]), const(kparams["b1row"]),
            const(kparams["e2"]), const(kparams["b2row"]),
            const(kparams["wtop"]), const(kparams["wmid"]),
            const(kparams["wbot"]), const(kparams["bbig"]),
            const(kparams["wq_row"]), const(kparams["bq"]),
        ],
        out_specs=pl.BlockSpec((bb, 1), lambda i: (i, 0)),
        compiler_params=pltpu.CompilerParams(
            dimension_semantics=("parallel",)),   # shards blocks across TCs on v7x
    )(x, a1, act,
      kparams["e1"], kparams["b1row"], kparams["e2"], kparams["b2row"],
      kparams["wtop"], kparams["wmid"], kparams["wbot"], kparams["bbig"],
      kparams["wq_row"], kparams["bq"])

    return jnp.squeeze(out[:B], axis=-1)          # mimics torch .squeeze() -> (B,)


# ---- host-side (one-time) weight expansion --------------------------------------
def prepare_kernel_params(p):
    """Expand PyTorch-layout weights into MXU-friendly tables.  conv1/conv2 never mix
    assets, so their im2col weight matrices are block-diagonal over the asset axis;
    conv3 + linear_state1 + linear_action (all linear, no activation between) fuse
    into three small matrices applied to y2 / a1 / action respectively.  Matmul
    weight tables are stored bf16 (f32 accumulate in-kernel); biases stay f32."""
    f32, bf16 = jnp.float32, jnp.bfloat16
    w1 = p["w1"][:, :, :, 0].astype(f32)           # (2, C, K1)
    w2 = p["w2"][:, :, :, 0].astype(f32)           # (CONV_DIM, 2, K2)
    w3 = p["w3"][0, :, 0, 0].astype(f32)           # (CONV_DIM + 1,)
    eye_w = jnp.eye(NUM_ASSETS, dtype=f32)

    # conv1:  y1[b,(co,ho,w)] = sum_{ci,kh} x[b,(ci,ho+kh,w)] * w1[co,ci,kh]
    shift = (jnp.arange(SEQ_LEN)[None, :, None]
             == jnp.arange(H1)[None, None, :] + jnp.arange(K1)[:, None, None]
             ).astype(f32)                                            # (K1, H, H1)
    e1 = jnp.einsum("ock,khg,wv->chwogv", w1, shift, eye_w)
    e1 = e1.reshape(X_FLAT, Y1_FLAT)                                  # (512, 192)
    b1row = jnp.broadcast_to(p["b1"][:, None, None],
                             (2, H1, NUM_ASSETS)).reshape(1, Y1_FLAT)

    # conv2:  y2[b,(cd,w)] = sum_{co,h} y1[b,(co,h,w)] * w2[cd,co,h]
    e2 = jnp.einsum("dch,wv->chwdv", w2, eye_w).reshape(Y1_FLAT, Y2_FLAT)  # (192, 64)
    b2row = jnp.broadcast_to(p["b2"][:, None],
                             (CONV_DIM, NUM_ASSETS)).reshape(1, Y2_FLAT)

    # conv3 . linear_state1 fused with linear_action:
    #   h_pre = y2 @ wtop + a1 @ wmid + action @ wbot + bbig
    wls_t = p["wls"].T                                                # (W, LIN)
    wtop = jnp.einsum("c,wf->cwf", w3[:CONV_DIM], wls_t).reshape(Y2_FLAT, LIN)
    wmid = w3[CONV_DIM] * wls_t                                       # a1 path (16,16)
    wbot = p["wla"].T                                                 # action path (16,16)
    bbig = (p["b3"][0] * jnp.sum(p["wls"], axis=1)
            + p["bls"] + p["bla"]).reshape(1, LIN)

    return {"e1": e1.astype(bf16), "b1row": b1row,
            "e2": e2.astype(bf16), "b2row": b2row,
            "wtop": wtop.astype(bf16), "wmid": wmid.astype(bf16),
            "wbot": wbot.astype(bf16), "bbig": bbig,
            "wq_row": p["wq"].reshape(1, LIN),
            "bq": p["bq"].reshape(1, 1)}


# ---- deterministic parameter init (PyTorch-style uniform fan-in) ------------------
def init_params(key):
    def u(k, shape, fan_in):
        bound = 1.0 / jnp.sqrt(jnp.float32(fan_in))
        return jax.random.uniform(k, shape, jnp.float32, -bound, bound)

    ks = jax.random.split(key, 12)
    return {
        "w1": u(ks[0], (2, NUM_FEATURES, K1, 1), NUM_FEATURES * K1),
        "b1": u(ks[1], (2,), NUM_FEATURES * K1),
        "w2": u(ks[2], (CONV_DIM, 2, K2, 1), 2 * K2),
        "b2": u(ks[3], (CONV_DIM,), 2 * K2),
        "w3": u(ks[4], (1, CONV_DIM + 1, 1, 1), CONV_DIM + 1),
        "b3": u(ks[5], (1,), CONV_DIM + 1),
        "wls": u(ks[6], (LIN, NUM_ASSETS), NUM_ASSETS),
        "bls": u(ks[7], (LIN,), NUM_ASSETS),
        "wla": u(ks[8], (LIN, NUM_ASSETS), NUM_ASSETS),
        "bla": u(ks[9], (LIN,), NUM_ASSETS),
        "wq": u(ks[10], (1, LIN), LIN),
        "bq": u(ks[11], (1,), LIN),
    }


# ---- pure-JAX reference (correctness check) ---------------------------------------
def ref_forward(p, x, a1, action):
    dn = ("NCHW", "OIHW", "NCHW")
    prec = lax.Precision.HIGHEST
    y = lax.conv_general_dilated(x, p["w1"], (1, 1), "VALID",
                                 dimension_numbers=dn, precision=prec)
    y = jnp.maximum(y + p["b1"][None, :, None, None], 0.0)
    y = lax.conv_general_dilated(y, p["w2"], (1, 1), "VALID",
                                 dimension_numbers=dn, precision=prec)
    y = jnp.maximum(y + p["b2"][None, :, None, None], 0.0)
    y = jnp.squeeze(y, axis=-2)                                        # (B, conv_dim, W)
    cat = jnp.concatenate([y, a1[:, None, :]], axis=1)[..., None]      # (B, cd+1, W, 1)
    y3 = lax.conv_general_dilated(cat, p["w3"], (1, 1), "VALID",
                                  dimension_numbers=dn, precision=prec)
    y3 = jnp.squeeze(y3 + p["b3"][None, :, None, None], axis=(1, 3))   # (B, W)
    sv = jnp.dot(y3, p["wls"].T, precision=prec) + p["bls"]
    av = jnp.dot(action, p["wla"].T, precision=prec) + p["bla"]
    h = jnp.maximum(sv + av, 0.0)
    q = jnp.dot(h, p["wq"].T, precision=prec) + p["bq"]
    return jnp.squeeze(q, axis=-1)


# ---- main -------------------------------------------------------------------------
if __name__ == "__main__":
    key = jax.random.PRNGKey(0)
    kp, kd = jax.random.split(key)
    params = init_params(kp)
    kparams = prepare_kernel_params(params)

    # B=2   : one padded 8-row block (pad-to-8 path)
    # B=13  : pad-to-16 + two 8-row blocks
    # B=600 : no pad, two ragged 304-row blocks (multi-block parallel grid)
    for B in (BATCH, 13, 600):
        kx, ka1, ka, kd = jax.random.split(kd, 4)
        sx  = jax.random.normal(kx,  (B, NUM_FEATURES, SEQ_LEN, NUM_ASSETS), jnp.float32)
        sa1 = jax.random.normal(ka1, (B, NUM_ASSETS), jnp.float32)   # state[1]
        act = jax.random.normal(ka,  (B, NUM_ASSETS), jnp.float32)

        out = jax.block_until_ready(critic_forward(kparams, sx, sa1, act))
        ref = ref_forward(params, sx, sa1, act)
        assert out.shape == (B,), out.shape
        # bf16 MXU operands (f32 accumulate) vs. a pure-f32 reference: observed error
        # is ~1e-3; 1e-2 leaves comfortable margin.
        assert jnp.allclose(out, ref, atol=1e-2, rtol=1e-2), \
            (B, float(jnp.max(jnp.abs(out - ref))))

    print("KERNEL_OK")
</pallas_src>

<mosaic_0001>
module attributes {stable_mosaic.version = 11 : i64} {
  func.func @_critic_kernel(%arg0: i32, %arg1: memref<8x512xf32, #tpu.memory_space<vmem>>, %arg2: memref<8x16xf32, #tpu.memory_space<vmem>>, %arg3: memref<8x16xf32, #tpu.memory_space<vmem>>, %arg4: memref<512x192xbf16, #tpu.memory_space<vmem>>, %arg5: memref<1x192xf32, #tpu.memory_space<vmem>>, %arg6: memref<192x64xbf16, #tpu.memory_space<vmem>>, %arg7: memref<1x64xf32, #tpu.memory_space<vmem>>, %arg8: memref<64x16xbf16, #tpu.memory_space<vmem>>, %arg9: memref<16x16xbf16, #tpu.memory_space<vmem>>, %arg10: memref<16x16xbf16, #tpu.memory_space<vmem>>, %arg11: memref<1x16xf32, #tpu.memory_space<vmem>>, %arg12: memref<1x16xf32, #tpu.memory_space<vmem>>, %arg13: memref<1x1xf32, #tpu.memory_space<vmem>>, %arg14: memref<8x1xf32, #tpu.memory_space<vmem>>) attributes {dimension_semantics = [#tpu.dimension_semantics<parallel>], iteration_bounds = array<i64: 1>, scalar_prefetch = 0 : i64, scratch_operands = 0 : i64, tpu.core_type = #tpu.core_type<tc>, window_params = [{transform_indices = @transform_0, window_bounds = array<i64: 8, 512>}, {transform_indices = @transform_1, window_bounds = array<i64: 8, 16>}, {transform_indices = @transform_2, window_bounds = array<i64: 8, 16>}, {pipeline_mode = #tpu.pipeline_mode<synchronous>, transform_indices = @transform_3, window_bounds = array<i64: 512, 192>}, {pipeline_mode = #tpu.pipeline_mode<synchronous>, transform_indices = @transform_4, window_bounds = array<i64: 1, 192>}, {pipeline_mode = #tpu.pipeline_mode<synchronous>, transform_indices = @transform_5, window_bounds = array<i64: 192, 64>}, {pipeline_mode = #tpu.pipeline_mode<synchronous>, transform_indices = @transform_6, window_bounds = array<i64: 1, 64>}, {pipeline_mode = #tpu.pipeline_mode<synchronous>, transform_indices = @transform_7, window_bounds = array<i64: 64, 16>}, {pipeline_mode = #tpu.pipeline_mode<synchronous>, transform_indices = @transform_8, window_bounds = array<i64: 16, 16>}, {pipeline_mode = #tpu.pipeline_mode<synchronous>, transform_indices = @transform_9, window_bounds = array<i64: 16, 16>}, {pipeline_mode = #tpu.pipeline_mode<synchronous>, transform_indices = @transform_10, window_bounds = array<i64: 1, 16>}, {pipeline_mode = #tpu.pipeline_mode<synchronous>, transform_indices = @transform_11, window_bounds = array<i64: 1, 16>}, {pipeline_mode = #tpu.pipeline_mode<synchronous>, transform_indices = @transform_12, window_bounds = array<i64: 1, 1>}, {transform_indices = @transform_13, window_bounds = array<i64: 8, 1>}]} {
    %c0 = arith.constant 0 : index
    %c0_0 = arith.constant 0 : index
    %0 = vector.load %arg1[%c0, %c0_0] : memref<8x512xf32, #tpu.memory_space<vmem>>, vector<8x512xf32>
    %1 = arith.truncf %0 : vector<8x512xf32> to vector<8x512xbf16>
    %c0_1 = arith.constant 0 : index
    %c0_2 = arith.constant 0 : index
    %2 = vector.load %arg4[%c0_1, %c0_2] : memref<512x192xbf16, #tpu.memory_space<vmem>>, vector<512x192xbf16>
    %cst = arith.constant dense<0.000000e+00> : vector<8x192xf32>
    %3 = tpu.matmul %1, %2, %cst {dimension_numbers = #tpu.dot_dimension_numbers<[1], [0], [0], [1], [0, 0, 1, 1], [], []>} : vector<8x512xbf16>, vector<512x192xbf16>, vector<8x192xf32> -> vector<8x192xf32>
    %c0_3 = arith.constant 0 : index
    %c0_4 = arith.constant 0 : index
    %4 = vector.load %arg5[%c0_3, %c0_4] : memref<1x192xf32, #tpu.memory_space<vmem>>, vector<1x192xf32>
    %5 = vector.broadcast %4 : vector<1x192xf32> to vector<8x192xf32>
    %6 = arith.addf %3, %5 : vector<8x192xf32>
    %cst_5 = arith.constant 0.000000e+00 : f32
    %7 = vector.broadcast %cst_5 : f32 to vector<8x192xf32>
    %8 = arith.maximumf %6, %7 : vector<8x192xf32>
    %9 = arith.truncf %8 : vector<8x192xf32> to vector<8x192xbf16>
    %c0_6 = arith.constant 0 : index
    %c0_7 = arith.constant 0 : index
    %10 = vector.load %arg6[%c0_6, %c0_7] : memref<192x64xbf16, #tpu.memory_space<vmem>>, vector<192x64xbf16>
    %cst_8 = arith.constant dense<0.000000e+00> : vector<8x64xf32>
    %11 = tpu.matmul %9, %10, %cst_8 {dimension_numbers = #tpu.dot_dimension_numbers<[1], [0], [0], [1], [0, 0, 1, 1], [], []>} : vector<8x192xbf16>, vector<192x64xbf16>, vector<8x64xf32> -> vector<8x64xf32>
    %c0_9 = arith.constant 0 : index
    %c0_10 = arith.constant 0 : index
    %12 = vector.load %arg7[%c0_9, %c0_10] : memref<1x64xf32, #tpu.memory_space<vmem>>, vector<1x64xf32>
    %13 = vector.broadcast %12 : vector<1x64xf32> to vector<8x64xf32>
    %14 = arith.addf %11, %13 : vector<8x64xf32>
    %cst_11 = arith.constant 0.000000e+00 : f32
    %15 = vector.broadcast %cst_11 : f32 to vector<8x64xf32>
    %16 = arith.maximumf %14, %15 : vector<8x64xf32>
    %17 = arith.truncf %16 : vector<8x64xf32> to vector<8x64xbf16>
    %c0_12 = arith.constant 0 : index
    %c0_13 = arith.constant 0 : index
    %18 = vector.load %arg8[%c0_12, %c0_13] : memref<64x16xbf16, #tpu.memory_space<vmem>>, vector<64x16xbf16>
    %cst_14 = arith.constant dense<0.000000e+00> : vector<8x16xf32>
    %19 = tpu.matmul %17, %18, %cst_14 {dimension_numbers = #tpu.dot_dimension_numbers<[1], [0], [0], [1], [0, 0, 1, 1], [], []>} : vector<8x64xbf16>, vector<64x16xbf16>, vector<8x16xf32> -> vector<8x16xf32>
    %c0_15 = arith.constant 0 : index
    %c0_16 = arith.constant 0 : index
    %20 = vector.load %arg2[%c0_15, %c0_16] : memref<8x16xf32, #tpu.memory_space<vmem>>, vector<8x16xf32>
    %21 = arith.truncf %20 : vector<8x16xf32> to vector<8x16xbf16>
    %c0_17 = arith.constant 0 : index
    %c0_18 = arith.constant 0 : index
    %22 = vector.load %arg9[%c0_17, %c0_18] : memref<16x16xbf16, #tpu.memory_space<vmem>>, vector<16x16xbf16>
    %cst_19 = arith.constant dense<0.000000e+00> : vector<8x16xf32>
    %23 = tpu.matmul %21, %22, %cst_19 {dimension_numbers = #tpu.dot_dimension_numbers<[1], [0], [0], [1], [0, 0, 1, 1], [], []>} : vector<8x16xbf16>, vector<16x16xbf16>, vector<8x16xf32> -> vector<8x16xf32>
    %24 = arith.addf %19, %23 : vector<8x16xf32>
    %c0_20 = arith.constant 0 : index
    %c0_21 = arith.constant 0 : index
    %25 = vector.load %arg3[%c0_20, %c0_21] : memref<8x16xf32, #tpu.memory_space<vmem>>, vector<8x16xf32>
    %26 = arith.truncf %25 : vector<8x16xf32> to vector<8x16xbf16>
    %c0_22 = arith.constant 0 : index
    %c0_23 = arith.constant 0 : index
    %27 = vector.load %arg10[%c0_22, %c0_23] : memref<16x16xbf16, #tpu.memory_space<vmem>>, vector<16x16xbf16>
    %cst_24 = arith.constant dense<0.000000e+00> : vector<8x16xf32>
    %28 = tpu.matmul %26, %27, %cst_24 {dimension_numbers = #tpu.dot_dimension_numbers<[1], [0], [0], [1], [0, 0, 1, 1], [], []>} : vector<8x16xbf16>, vector<16x16xbf16>, vector<8x16xf32> -> vector<8x16xf32>
    %29 = arith.addf %24, %28 : vector<8x16xf32>
    %c0_25 = arith.constant 0 : index
    %c0_26 = arith.constant 0 : index
    %30 = vector.load %arg11[%c0_25, %c0_26] : memref<1x16xf32, #tpu.memory_space<vmem>>, vector<1x16xf32>
    %31 = vector.broadcast %30 : vector<1x16xf32> to vector<8x16xf32>
    %32 = arith.addf %29, %31 : vector<8x16xf32>
    %cst_27 = arith.constant 0.000000e+00 : f32
    %33 = vector.broadcast %cst_27 : f32 to vector<8x16xf32>
    %34 = arith.maximumf %32, %33 : vector<8x16xf32>
    %c0_28 = arith.constant 0 : index
    %c0_29 = arith.constant 0 : index
    %35 = vector.load %arg12[%c0_28, %c0_29] : memref<1x16xf32, #tpu.memory_space<vmem>>, vector<1x16xf32>
    %36 = vector.broadcast %35 : vector<1x16xf32> to vector<8x16xf32>
    %37 = arith.mulf %34, %36 : vector<8x16xf32>
    %cst_30 = arith.constant dense<0.000000e+00> : vector<8xf32>
    %38 = vector.multi_reduction <add>, %37, %cst_30 [1] : vector<8x16xf32> to vector<8xf32>
    %39 = vector.shape_cast %38 : vector<8xf32> to vector<8x1xf32>
    %c0_31 = arith.constant 0 : index
    %c0_32 = arith.constant 0 : index
    %40 = vector.load %arg13[%c0_31, %c0_32] : memref<1x1xf32, #tpu.memory_space<vmem>>, vector<1x1xf32>
    %41 = vector.broadcast %40 : vector<1x1xf32> to vector<8x1xf32>
    %42 = arith.addf %39, %41 : vector<8x1xf32>
    %c0_33 = arith.constant 0 : index
    %c0_34 = arith.constant 0 : index
    %43 = vector.load %arg14[%c0_33, %c0_34] : memref<8x1xf32, #tpu.memory_space<vmem>>, vector<8x1xf32>
    tpu.vector_store %arg14[%c0_33, %c0_34], %42 {strides = array<i32>} : memref<8x1xf32, #tpu.memory_space<vmem>>, vector<8x1xf32>,
    return
  }
  func.func @transform_0(%arg0: i32) -> (i32, i32) {
    %c0_i32 = arith.constant 0 : i32
    %c0_i32_0 = arith.constant 0 : i32
    return %arg0, %c0_i32 : i32, i32
  }
  func.func @transform_1(%arg0: i32) -> (i32, i32) {
    %c0_i32 = arith.constant 0 : i32
    %c0_i32_0 = arith.constant 0 : i32
    return %arg0, %c0_i32 : i32, i32
  }
  func.func @transform_2(%arg0: i32) -> (i32, i32) {
    %c0_i32 = arith.constant 0 : i32
    %c0_i32_0 = arith.constant 0 : i32
    return %arg0, %c0_i32 : i32, i32
  }
  func.func @transform_3(%arg0: i32) -> (i32, i32) {
    %c0_i32 = arith.constant 0 : i32
    %c0_i32_0 = arith.constant 0 : i32
    %c0_i32_1 = arith.constant 0 : i32
    return %c0_i32, %c0_i32_0 : i32, i32
  }
  func.func @transform_4(%arg0: i32) -> (i32, i32) {
    %c0_i32 = arith.constant 0 : i32
    %c0_i32_0 = arith.constant 0 : i32
    %c0_i32_1 = arith.constant 0 : i32
    return %c0_i32, %c0_i32_0 : i32, i32
  }
  func.func @transform_5(%arg0: i32) -> (i32, i32) {
    %c0_i32 = arith.constant 0 : i32
    %c0_i32_0 = arith.constant 0 : i32
    %c0_i32_1 = arith.constant 0 : i32
    return %c0_i32, %c0_i32_0 : i32, i32
  }
  func.func @transform_6(%arg0: i32) -> (i32, i32) {
    %c0_i32 = arith.constant 0 : i32
    %c0_i32_0 = arith.constant 0 : i32
    %c0_i32_1 = arith.constant 0 : i32
    return %c0_i32, %c0_i32_0 : i32, i32
  }
  func.func @transform_7(%arg0: i32) -> (i32, i32) {
    %c0_i32 = arith.constant 0 : i32
    %c0_i32_0 = arith.constant 0 : i32
    %c0_i32_1 = arith.constant 0 : i32
    return %c0_i32, %c0_i32_0 : i32, i32
  }
  func.func @transform_8(%arg0: i32) -> (i32, i32) {
    %c0_i32 = arith.constant 0 : i32
    %c0_i32_0 = arith.constant 0 : i32
    %c0_i32_1 = arith.constant 0 : i32
    return %c0_i32, %c0_i32_0 : i32, i32
  }
  func.func @transform_9(%arg0: i32) -> (i32, i32) {
    %c0_i32 = arith.constant 0 : i32
    %c0_i32_0 = arith.constant 0 : i32
    %c0_i32_1 = arith.constant 0 : i32
    return %c0_i32, %c0_i32_0 : i32, i32
  }
  func.func @transform_10(%arg0: i32) -> (i32, i32) {
    %c0_i32 = arith.constant 0 : i32
    %c0_i32_0 = arith.constant 0 : i32
    %c0_i32_1 = arith.constant 0 : i32
    return %c0_i32, %c0_i32_0 : i32, i32
  }
  func.func @transform_11(%arg0: i32) -> (i32, i32) {
    %c0_i32 = arith.constant 0 : i32
    %c0_i32_0 = arith.constant 0 : i32
    %c0_i32_1 = arith.constant 0 : i32
    return %c0_i32, %c0_i32_0 : i32, i32
  }
  func.func @transform_12(%arg0: i32) -> (i32, i32) {
    %c0_i32 = arith.constant 0 : i32
    %c0_i32_0 = arith.constant 0 : i32
    %c0_i32_1 = arith.constant 0 : i32
    return %c0_i32, %c0_i32_0 : i32, i32
  }
  func.func @transform_13(%arg0: i32) -> (i32, i32) {
    %c0_i32 = arith.constant 0 : i32
    %c0_i32_0 = arith.constant 0 : i32
    return %arg0, %c0_i32 : i32, i32
  }
}

</mosaic_0001>

<bundles_post_ra>
// kernel: critic_forward.1
= control target key start
LH: loop header
LB: loop body
LE: loop exit
PB: predicated region body
PF: predicated region fallthrough
CT: control target
= control target key end

     0   :  { %v1149_v4 = vmov 0   ;;  %vm640_vm0 = vcmask 523264   ;;  %vm1151_vm1 = vmmov 0   ;;  %vm704_vm2 = vcmask 130048   ;;  %s1524_s3 = inlined_call_operand.vmem [shape: bf16[512,192], index: 3, kind: input, shape index: {}]   ;;  %s1525_s0 = inlined_call_operand.vmem [shape: f32[8,512], index: 0, kind: input, shape index: {}]   ;;  %s1526_s5 = inlined_call_operand.vmem [shape: bf16[192,64], index: 5, kind: input, shape index: {}]   ;;  %s1527_s8 = inlined_call_operand.vmem [shape: bf16[16,16], index: 8, kind: input, shape index: {}]   ;;  %s1528_s7 = inlined_call_operand.vmem [shape: bf16[64,16], index: 7, kind: input, shape index: {}]   ;;  %s1529_s4 = inlined_call_operand.vmem [shape: f32[1,192], index: 4, kind: input, shape index: {}]   ;;  %s1530_s1 = inlined_call_operand.vmem [shape: f32[8,16], index: 1, kind: input, shape index: {}]   ;;  %s1531_s9 = inlined_call_operand.vmem [shape: bf16[16,16], index: 9, kind: input, shape index: {}]   ;;  %s1532_s6 = inlined_call_operand.vmem [shape: f32[1,64], index: 6, kind: input, shape index: {}]   ;;  %s1533_s2 = inlined_call_operand.vmem [shape: f32[8,16], index: 2, kind: input, shape index: {}]   ;;  %s1534_s12 = inlined_call_operand.<no memory space> [shape: f32[1,1], index: 12, kind: input, shape index: {}]   ;;  %s1535_s10 = inlined_call_operand.vmem [shape: f32[1,16], index: 10, kind: input, shape index: {}]   ;;  %s1536_s11 = inlined_call_operand.vmem [shape: f32[1,16], index: 11, kind: input, shape index: {}]   ;;  %s1537_s13 = inlined_call_operand.vmem [shape: f32[8,1], index: 13, kind: output, shape index: {}]  }
   0x1   :  { %v1035_v0 = vld [vmem:[%s1524_s3 + $0x4] ss:$8 sps:$4 sm:$0xff]   ;;  %v1037_v1 = vld [vmem:[%s1524_s3] ss:$8 sps:$4 sm:$0xff]   ;;  %v1038_v2 = vld [vmem:[%s1524_s3 + $0x14] ss:$8 sps:$4 sm:$0xff]   ;;  %644 = vmatprep.subr.bf16.mxu1 %v1149_v4 }
   0x2   :  { %451 = vmatprep.subr.bf16.mxu0 %v1035_v0  ;;  %v1040_v3 = vld [vmem:[%s1524_s3 + $0x10] ss:$8 sps:$4 sm:$0xff]   ;;  %v1041_v5 = vld [vmem:[%s1524_s3 + $0x24] ss:$8 sps:$4 sm:$0xff]   ;;  %v1043_v6 = vld [vmem:[%s1524_s3 + $0x20] ss:$8 sps:$4 sm:$0xff]  }
   0x3   :  { %452 = vmatpush1.bf16.msra.mxu0 %v1037_v1  ;;  %v1044_v7 = vld [vmem:[%s1524_s3 + $0x34] ss:$8 sps:$4 sm:$0xff]   ;;  %v1046_v8 = vld [vmem:[%s1524_s3 + $0x30] ss:$8 sps:$4 sm:$0xff]   ;;  %v1047_v9 = vld [vmem:[%s1524_s3 + $0x44] ss:$8 sps:$4 sm:$0xff]  }
   0x4   :  { %453 = vmatprep.subr.bf16.mxu0 %v1038_v2  ;;  %v1049_v10 = vld [vmem:[%s1524_s3 + $0x40] ss:$8 sps:$4 sm:$0xff]   ;;  %v1050_v11 = vld [vmem:[%s1524_s3 + $0x54] ss:$8 sps:$4 sm:$0xff]   ;;  %v1052_v12 = vld [vmem:[%s1524_s3 + $0x50] ss:$8 sps:$4 sm:$0xff]  }
   0x5   :  { %v1053_v13 = vld [vmem:[%s1524_s3 + $0x64] ss:$8 sps:$4 sm:$0xff]   ;;  %v1055_v16 = vld [vmem:[%s1524_s3 + $0x60] ss:$8 sps:$4 sm:$0xff]   ;;  %v1056_v17 = vld [vmem:[%s1524_s3 + $0x74] ss:$8 sps:$4 sm:$0xff]  }
   0x6   :  { %v48_v14 = vld [vmem:[%s1525_s0 + $0x8] sm:$0xff]  ;;  %v1058_v18 = vld [vmem:[%s1524_s3 + $0x70] ss:$8 sps:$4 sm:$0xff]   ;;  %v1062_v21 = vld [vmem:[%s1524_s3 + $0x94] ss:$8 sps:$4 sm:$0xff]   ;;  %vm897_vm3 = vcmask 7168  }
   0x7   :  { %454 = vmatpush1.bf16.msra.mxu0 %v1040_v3  ;;  %v52_v15 = vpack.c.bf16 %v48_v14, %v48_v14  ;;  %v1059_v19 = vld [vmem:[%s1524_s3 + $0x84] ss:$8 sps:$4 sm:$0xff]   ;;  %v1061_v20 = vld [vmem:[%s1524_s3 + $0x80] ss:$8 sps:$4 sm:$0xff]   ;;  %v1064_v22 = vld [vmem:[%s1524_s3 + $0x90] ss:$8 sps:$4 sm:$0xff]  }
   0x8   :  { %455 = vmatprep.subr.bf16.mxu0 %v1041_v5  ;;  %v1065_v23 = vld [vmem:[%s1524_s3 + $0xa4] ss:$8 sps:$4 sm:$0xff]   ;;  %v1067_v24 = vld [vmem:[%s1524_s3 + $0xa0] ss:$8 sps:$4 sm:$0xff]   ;;  %v1068_v25 = vld [vmem:[%s1524_s3 + $0xb4] ss:$8 sps:$4 sm:$0xff]  }
   0x9   :  { %483 = vmatprep.mubr.bf16.mxu0 %v52_v15  ;;  %v1070_v26 = vld [vmem:[%s1524_s3 + $0xb0] ss:$8 sps:$4 sm:$0xff]   ;;  %v1071_v27 = vld [vmem:[%s1524_s3 + $0xc4] ss:$8 sps:$4 sm:$0xff]   ;;  %v1073_v30 = vld [vmem:[%s1524_s3 + $0xc0] ss:$8 sps:$4 sm:$0xff]  }
   0xa   :  { %v1131_v28 = vld [vmem:[%s1526_s5] sm:$0xff]   ;;  %v1132_v29 = vld [vmem:[%s1526_s5 + $0x8] sm:$0xff]   ;;  %v1074_v31 = vld [vmem:[%s1524_s3 + $0xd4] ss:$8 sps:$4 sm:$0xff]  }
   0xb   :  { %456 = vmatpush1.bf16.msra.mxu0 %v1043_v6  ;;  %645 = vmatpush1.bf16.msra.mxu1 %v1131_v28  ;;  %v1133_v32 = vld [vmem:[%s1526_s5 + $0x10] sm:$0xff]   ;;  %v1077_v34 = vld [vmem:[%s1524_s3 + $0xe4] ss:$8 sps:$4 sm:$0xff]   ;;  %v1134_v35 = vld [vmem:[%s1526_s5 + $0x18] sm:$0xff]  }
   0xc   :  { %457 = vmatprep.subr.bf16.mxu0 %v1044_v7  ;;  %646 = vmatprep.subr.bf16.mxu1 %v1149_v4  ;;  %v1076_v33 = vld [vmem:[%s1524_s3 + $0xd0] ss:$8 sps:$4 sm:$0xff]   ;;  %v1079_v36 = vld [vmem:[%s1524_s3 + $0xe0] ss:$8 sps:$4 sm:$0xff]   ;;  %v1080_v37 = vld [vmem:[%s1524_s3 + $0xf4] ss:$8 sps:$4 sm:$0xff]  }
   0xd   :  { %v1135_v38 = vld [vmem:[%s1526_s5 + $0x20] sm:$0xff]   ;;  %v1082_v39 = vld [vmem:[%s1524_s3 + $0xf0] ss:$8 sps:$4 sm:$0xff]   ;;  %v1136_v44 = vld [vmem:[%s1526_s5 + $0x28] sm:$0xff]  }
   0xe   :  { %v47_v40 = vld [vmem:[%s1525_s0] sm:$0xff]  ;;  %v50_v42 = vld [vmem:[%s1525_s0 + $0x18] sm:$0xff]  ;;  %v1137_v48 = vld [vmem:[%s1526_s5 + $0x30] sm:$0xff]  }
   0xf   :  { %458 = vmatpush1.bf16.msra.mxu0 %v1046_v8  ;;  %647 = vmatpush1.bf16.msra.mxu1 %v1132_v29  ;;  %v1085_v41 = vld [vmem:[%s1524_s3 + $0x104] ss:$8 sps:$4 sm:$0xff]   ;;  %v51_v43 = vpack.c.bf16 %v47_v40, %v47_v40  ;;  %v1083_v45 = vld [vmem:[%s1524_s3 + $0x100] ss:$8 sps:$4 sm:$0xff]   ;;  %v54_v46 = vpack.c.bf16 %v50_v42, %v50_v42  ;;  %v1088_v47 = vld [vmem:[%s1524_s3 + $0x114] ss:$8 sps:$4 sm:$0xff]  }
  0x10   :  { %459 = vmatprep.subr.bf16.mxu0 %v1047_v9  ;;  %648 = vmatprep.subr.bf16.mxu1 %v1149_v4  ;;  %v1086_v49 = vld [vmem:[%s1524_s3 + $0x110] ss:$8 sps:$4 sm:$0xff]   ;;  %v1091_v50 = vld [vmem:[%s1524_s3 + $0x124] ss:$8 sps:$4 sm:$0xff]   ;;  %v1089_v52 = vld [vmem:[%s1524_s3 + $0x120] ss:$8 sps:$4 sm:$0xff]  }
  0x11   :  { %v1138_v51 = vld [vmem:[%s1526_s5 + $0x38] sm:$0xff]   ;;  %v1139_v54 = vld [vmem:[%s1526_s5 + $0x40] sm:$0xff]   ;;  %v1140_v57 = vld [vmem:[%s1526_s5 + $0x48] sm:$0xff]  }
  0x12   :  { %v1094_v53 = vld [vmem:[%s1524_s3 + $0x134] ss:$8 sps:$4 sm:$0xff]   ;;  %v1092_v55 = vld [vmem:[%s1524_s3 + $0x130] ss:$8 sps:$4 sm:$0xff]   ;;  %v1097_v56 = vld [vmem:[%s1524_s3 + $0x144] ss:$8 sps:$4 sm:$0xff]  }
  0x13   :  { %460 = vmatpush1.bf16.msra.mxu0 %v1049_v10  ;;  %649 = vmatpush1.bf16.msra.mxu1 %v1133_v32  ;;  %v1095_v58 = vld [vmem:[%s1524_s3 + $0x140] ss:$8 sps:$4 sm:$0xff]   ;;  %v1100_v59 = vld [vmem:[%s1524_s3 + $0x154] ss:$8 sps:$4 sm:$0xff]   ;;  %v1098_v60 = vld [vmem:[%s1524_s3 + $0x150] ss:$8 sps:$4 sm:$0xff]  }
  0x14   :  { %461 = vmatprep.subr.bf16.mxu0 %v1050_v11  ;;  %650 = vmatprep.subr.bf16.mxu1 %v1149_v4  ;;  %v1103_v61 = vld [vmem:[%s1524_s3 + $0x164] ss:$8 sps:$4 sm:$0xff]   ;;  %v1101_v62 = vld [vmem:[%s1524_s3 + $0x160] ss:$8 sps:$4 sm:$0xff]   ;;  %v1106_v63 = vld [vmem:[%s1524_s3 + $0x174] ss:$8 sps:$4 sm:$0xff]  }
  0x15   :  { %v1104_v0 = vld [vmem:[%s1524_s3 + $0x170] ss:$8 sps:$4 sm:$0xff]   ;;  %v1109_v1 = vld [vmem:[%s1524_s3 + $0x184] ss:$8 sps:$4 sm:$0xff]   ;;  %v1107_v2 = vld [vmem:[%s1524_s3 + $0x180] ss:$8 sps:$4 sm:$0xff]  }
  0x16   :  { %v1112_v3 = vld [vmem:[%s1524_s3 + $0x194] ss:$8 sps:$4 sm:$0xff]   ;;  %v1110_v5 = vld [vmem:[%s1524_s3 + $0x190] ss:$8 sps:$4 sm:$0xff]   ;;  %v1115_v6 = vld [vmem:[%s1524_s3 + $0x1a4] ss:$8 sps:$4 sm:$0xff]  }
  0x17   :  { %462 = vmatpush1.bf16.msra.mxu0 %v1052_v12  ;;  %651 = vmatpush1.bf16.msra.mxu1 %v1134_v35  ;;  %v1113_v7 = vld [vmem:[%s1524_s3 + $0x1a0] ss:$8 sps:$4 sm:$0xff]   ;;  %v1118_v8 = vld [vmem:[%s1524_s3 + $0x1b4] ss:$8 sps:$4 sm:$0xff]   ;;  %v1116_v9 = vld [vmem:[%s1524_s3 + $0x1b0] ss:$8 sps:$4 sm:$0xff]  }
  0x18   :  { %463 = vmatprep.subr.bf16.mxu0 %v1053_v13  ;;  %652 = vmatprep.subr.bf16.mxu1 %v1149_v4  ;;  %v1121_v10 = vld [vmem:[%s1524_s3 + $0x1c4] ss:$8 sps:$4 sm:$0xff]   ;;  %v1119_v11 = vld [vmem:[%s1524_s3 + $0x1c0] ss:$8 sps:$4 sm:$0xff]   ;;  %v1124_v12 = vld [vmem:[%s1524_s3 + $0x1d4] ss:$8 sps:$4 sm:$0xff]  }
  0x19   :  { %v1122_v13 = vld [vmem:[%s1524_s3 + $0x1d0] ss:$8 sps:$4 sm:$0xff]   ;;  %v1127_v14 = vld [vmem:[%s1524_s3 + $0x1e4] ss:$8 sps:$4 sm:$0xff]   ;;  %v1125_v15 = vld [vmem:[%s1524_s3 + $0x1e0] ss:$8 sps:$4 sm:$0xff]  }
  0x1a   :  { %v694_v40 = vld [vmem:[%s1530_s1] sm:$0xff] }
  0x1b   :  { %464 = vmatpush1.bf16.msra.mxu0 %v1055_v16  ;;  %653 = vmatpush1.bf16.msra.mxu1 %v1135_v38  ;;  %v1130_v16 = vld [vmem:[%s1524_s3 + $0x1f4] ss:$8 sps:$4 sm:$0xff]   ;;  %v1143_v38 = vld [vmem:[%s1527_s8] sm:$0xff]  }
  0x1c   :  { %465 = vmatprep.subr.bf16.mxu0 %v1056_v17  ;;  %654 = vmatprep.subr.bf16.mxu1 %v1149_v4  ;;  %v1128_v17 = vld [vmem:[%s1524_s3 + $0x1f0] ss:$8 sps:$4 sm:$0xff]   ;;  %v1144_v42 = vld [vmem:[%s1528_s7] sm:$0xff]  }
  0x1f   :  { %466 = vmatpush1.bf16.msra.mxu0 %v1058_v18  ;;  %655 = vmatpush1.bf16.msra.mxu1 %v1136_v44  ;;  %v49_v18 = vld [vmem:[%s1525_s0 + $0x10] sm:$0xff] }
  0x20   :  { %467 = vmatprep.subr.bf16.mxu0 %v1059_v19  ;;  %656 = vmatprep.subr.bf16.mxu1 %v1149_v4  ;;  %v53_v19 = vpack.c.bf16 %v49_v18, %v49_v18  ;;  %v1146_v44 = vld [vmem:[%s1528_s7 + $0x10] sm:$0xff]  }
  0x23   :  { %468 = vmatpush1.bf16.msra.mxu0 %v1061_v20  ;;  %657 = vmatpush1.bf16.msra.mxu1 %v1137_v48  ;;  %v1141_v20 = vld [vmem:[%s1526_s5 + $0x50] sm:$0xff]  }
  0x24   :  { %469 = vmatprep.subr.bf16.mxu0 %v1062_v21  ;;  %658 = vmatprep.subr.bf16.mxu1 %v1149_v4  ;;  %v1142_v21 = vld [vmem:[%s1526_s5 + $0x58] sm:$0xff]  }
  0x27   :  { %470 = vmatpush1.bf16.msra.mxu0 %v1064_v22  ;;  %659 = vmatpush1.bf16.msra.mxu1 %v1138_v51  ;;  %v1150_v22 = vmov 0.0  }
  0x28   :  { %471 = vmatprep.subr.bf16.mxu0 %v1065_v23  ;;  %660 = vmatprep.subr.bf16.mxu1 %v1149_v4  ;;  %v121_v23 = vlaneseq }
  0x2b   :  { %472 = vmatpush1.bf16.msra.mxu0 %v1067_v24  ;;  %661 = vmatpush1.bf16.msra.mxu1 %v1139_v54  ;;  %v122_v24 = vshrl.u32 %v121_v23, 7 }
  0x2c   :  { %473 = vmatprep.subr.bf16.mxu0 %v1068_v25  ;;  %662 = vmatprep.subr.bf16.mxu1 %v1149_v4 }
  0x2d   :  { %v123_v25 = vsub.s32 0, %v122_v24 }
  0x2f   :  { %474 = vmatpush1.bf16.msra.mxu0 %v1070_v26  ;;  %663 = vmatpush1.bf16.msra.mxu1 %v1140_v57  ;;  %v119_v26 = vld [vmem:[%s1529_s4] sm:$0x3] }
  0x30   :  { %475 = vmatprep.subr.bf16.mxu0 %v1071_v27  ;;  %664 = vmatprep.subr.bf16.mxu1 %v1149_v4  ;;  %v127_v27 = vsub.s32 1, %v122_v24  ;;  %v124_v28 = vrot.slane %v119_v26, %v123_v25 }
  0x32   :  { %v128_v29 = vrot.slane %v119_v26, %v127_v27 }
  0x33   :  { %476 = vmatpush1.bf16.msra.mxu0 %v1073_v30  ;;  %665 = vmatpush1.bf16.msra.mxu1 %v1141_v20 }
  0x34   :  { %477 = vmatprep.subr.bf16.mxu0 %v1074_v31  ;;  %666 = vmatprep.subr.bf16.mxu1 %v1149_v4 }
  0x37   :  { %478 = vmatpush1.bf16.msra.mxu0 %v1076_v33  ;;  %667 = vmatpush1.bf16.msra.mxu1 %v1142_v21 }
  0x38   :  { %479 = vmatprep.subr.bf16.mxu0 %v1077_v34  ;;  %1002 = vmatprep.subr.bf16.mxu1 %v1150_v22 }
  0x3b   :  { %480 = vmatpush1.bf16.msra.mxu0 %v1079_v36 }
  0x3c   :  { %481 = vmatprep.subr.bf16.mxu0 %v1080_v37 }
  0x3f   :  { %482 = vmatpush1.bf16.msra.mxu0 %v1082_v39 }
  0x40   :  { %492 = vmatprep.subr.bf16.mxu0 %v1085_v41  ;;  %v695_v41 = vpack.c.bf16 %v694_v40, %v694_v40 }
  0x42   :  { %484 = vmatmul.mubr.bf16.vlgmr.msra.gmra.mrb[0].mxu0 %v51_v43  ;;  %v1145_v43 = vld [vmem:[%s1528_s7 + $0x8] sm:$0xff]  }
  0x43   :  { %493 = vmatpush1.bf16.msra.mxu0 %v1083_v45  ;;  %524 = vmatprep.mubr.bf16.mxu0 %v54_v46  ;;  %v1147_v45 = vld [vmem:[%s1528_s7 + $0x18] sm:$0xff]   ;;  %v967_v46 = vld [vmem:[%s1532_s6] ss:$0 sm:$0xff] }
  0x44   :  { %494 = vmatprep.subr.bf16.mxu0 %v1088_v47 }
  0x47   :  { %495 = vmatpush1.bf16.msra.mxu0 %v1086_v49 }
  0x48   :  { %496 = vmatprep.subr.bf16.mxu0 %v1091_v50 }
  0x4b   :  { %497 = vmatpush1.bf16.msra.mxu0 %v1089_v52 }
  0x4c   :  { %498 = vmatprep.subr.bf16.mxu0 %v1094_v53  ;;  %v1148_v53 = vld [vmem:[%s1531_s9] sm:$0xff]  }
  0x4f   :  { %499 = vmatpush1.bf16.msra.mxu0 %v1092_v55  ;;  %v815_v55 = vld [vmem:[%s1533_s2] sm:$0xff] }
  0x50   :  { %500 = vmatprep.subr.bf16.mxu0 %v1097_v56 }
  0x53   :  { %501 = vmatpush1.bf16.msra.mxu0 %v1095_v58 }
  0x54   :  { %502 = vmatprep.subr.bf16.mxu0 %v1100_v59  ;;  %v816_v59 = vpack.c.bf16 %v815_v55, %v815_v55 }
  0x57   :  { %503 = vmatpush1.bf16.msra.mxu0 %v1098_v60 }
  0x58   :  { %504 = vmatprep.subr.bf16.mxu0 %v1103_v61  ;;  %v18_v61 = vstv %s1534_s12 }
  0x59   :  { %19 = vst [vmem:[#allocation2] sm:$0x1] %v18_v61 }
  0x5b   :  { %505 = vmatpush1.bf16.msra.mxu0 %v1101_v62 }
  0x5c   :  { %506 = vmatprep.subr.bf16.mxu0 %v1106_v63 }
  0x5f   :  { %507 = vmatpush1.bf16.msra.mxu0 %v1104_v0 }
  0x60   :  { %508 = vmatprep.subr.bf16.mxu0 %v1109_v1 }
  0x63   :  { %509 = vmatpush1.bf16.msra.mxu0 %v1107_v2 }
  0x64   :  { %510 = vmatprep.subr.bf16.mxu0 %v1112_v3 }
  0x67   :  { %511 = vmatpush1.bf16.msra.mxu0 %v1110_v5  ;;  %v990_v5 = vld [vmem:[%s1535_s10] ss:$0 sm:$0xff] }
  0x68   :  { %512 = vmatprep.subr.bf16.mxu0 %v1115_v6 }
  0x6b   :  { %513 = vmatpush1.bf16.msra.mxu0 %v1113_v7 }
  0x6c   :  { %514 = vmatprep.subr.bf16.mxu0 %v1118_v8 }
  0x6f   :  { %515 = vmatpush1.bf16.msra.mxu0 %v1116_v9 }
  0x70   :  { %516 = vmatprep.subr.bf16.mxu0 %v1121_v10 }
  0x73   :  { %517 = vmatpush1.bf16.msra.mxu0 %v1119_v11  ;;  %v991_v11 = vld [vmem:[%s1536_s11] ss:$0 sm:$0xff] }
  0x74   :  { %518 = vmatprep.subr.bf16.mxu0 %v1124_v12 }
  0x77   :  { %519 = vmatpush1.bf16.msra.mxu0 %v1122_v13 }
  0x78   :  { %520 = vmatprep.subr.bf16.mxu0 %v1127_v14 }
  0x7b   :  { %521 = vmatpush1.bf16.msra.mxu0 %v1125_v15  ;;  %v992_v15 = vld [vmem:[#allocation2] ss:$0 sm:$0xff] }
  0x7c   :  { %522 = vmatprep.subr.bf16.mxu0 %v1130_v16 }
  0x7f   :  { %523 = vmatpush1.bf16.msra.mxu0 %v1128_v17 }
  0x82   :  { %525 = vmatmul.mubr.bf16.vlgmr.msra.gmra.mrb[0].mxu0 %v53_v19 }
 0x155   :  { %v526_v30 = vpop.f32.mrb[0].mxu0 }
 0x156   :  { %v1026_v31 = vadd.f32 %v526_v30, %v124_v28  ;;  %v528_v4 = vpop.f32.mrb[1].mxu0 }
 0x157   :  { %v1027_v32 = vadd.f32 %v528_v4, %v128_v29  ;;  %v530_v33 = vpop.f32.mrb[2].mxu0 }
 0x158   :  { %v533_v34 = vmax.f32 %v1026_v31, 0.0  ;;  %v531_v35 = vpop.f32.mrb[3].mxu0 }
 0x159   :  { %v534_v36 = vmax.f32 %v1027_v32, 0.0 }
 0x15a   :  { %v535_v39 = vpack.c.bf16 %v533_v34, %v533_v34 }
 0x15b   :  { %v536_v37 = vpack.c.bf16 %v534_v36, %v534_v36 }
 0x15d   :  { %980 = vmatprep.mubr.msk.bf16.mxu1 %vm640_vm0, %v536_v37 }
 0x15e   :  { %677 = vmatmul.mubr.bf16.vlgmr.msra.gmra.mrb[0].mxu1 %v535_v39 }
 0x15f   :  { %1003 = vmatpush3.bf16.msra.mxu1 %v1143_v38  ;;  %1004 = vmatprep.mubr.msk.bf16.mxu1 %vm1151_vm1, %v1150_v22 }
 0x160   :  { %1008 = vmatprep.subr.bf16.mxu1 %v1150_v22 }
 0x166   :  { %1005 = vmatmul.mubr.msk.bf16.vlgmr.msra.gmra.mrb[4].mxu1 %vm704_vm2, %v695_v41 }
 0x167   :  { %1009 = vmatpush3.bf16.msra.mxu1 %v1144_v42  ;;  %1016 = vmatprep.mubr.msk.bf16.mxu1 %vm1151_vm1, %v1150_v22 }
 0x168   :  { %1010 = vmatprep.subr.bf16.mxu1 %v1150_v22 }
 0x16b   :  { %1011 = vmatpush3.bf16.msra.mxu1 %v1145_v43 }
 0x16c   :  { %1012 = vmatprep.subr.bf16.mxu1 %v1150_v22 }
 0x16f   :  { %1013 = vmatpush3.bf16.msra.mxu1 %v1146_v44 }
 0x170   :  { %1014 = vmatprep.subr.bf16.mxu1 %v1150_v22 }
 0x173   :  { %1015 = vmatpush3.bf16.msra.mxu1 %v1147_v45 }
 0x174   :  { %1020 = vmatprep.subr.bf16.mxu1 %v1150_v22 }
 0x231   :  { %v678_v47 = vpop.f32.mrb[0].mxu1 }
 0x232   :  { %v679_v48 = vadd.f32 %v967_v46, %v678_v47  ;;  %v680_v49 = vpop.f32.mrb[1].mxu1 }
 0x233   :  { %v681_v50 = vpop.f32.mrb[2].mxu1 }
 0x234   :  { %v684_v51 = vmax.f32 %v679_v48, 0.0  ;;  %v682_v52 = vpop.f32.mrb[3].mxu1 }
 0x236   :  { %v685_v54 = vpack.c.bf16 %v684_v51, %v684_v51 }
 0x238   :  { %1017 = vmatmul.mubr.msk.bf16.vlgmr.msra.gmra.mrb[8].mxu1 %vm640_vm0, %v685_v54 }
 0x239   :  { %1021 = vmatpush3.bf16.msra.mxu1 %v1148_v53  ;;  %1022 = vmatprep.mubr.msk.bf16.mxu1 %vm1151_vm1, %v1150_v22  ;;  %v742_v56 = vpop.f32.mrb[4].mxu1 }
 0x23a   :  { %v1006_v57 = vpop.f32.mrb[5].mxu1 }
 0x23b   :  { %v745_v58 = vpop.f32.mrb[6].mxu1 }
 0x23c   :  { %v1007_v60 = vpop.f32.mrb[7].mxu1 }
 0x240   :  { %1023 = vmatmul.mubr.msk.bf16.vlgmr.msra.gmra.mrb[12].mxu1 %vm704_vm2, %v816_v59 }
 0x30b   :  { %v809_v62 = vpop.f32.mrb[8].mxu1 }
 0x30c   :  { %v810_v63 = vadd.f32 %v809_v62, %v742_v56  ;;  %v1018_v0 = vpop.f32.mrb[9].mxu1 }
 0x30d   :  { %v812_v1 = vpop.f32.mrb[10].mxu1 }
 0x30e   :  { %v1019_v2 = vpop.f32.mrb[11].mxu1 }
 0x313   :  { %v862_v3 = vpop.f32.mrb[12].mxu1 }
 0x314   :  { %v868_v6 = vadd.f32 %v862_v3, %v810_v63  ;;  %v1024_v7 = vpop.f32.mrb[13].mxu1 }
 0x315   :  { %v865_v8 = vpop.f32.mrb[14].mxu1 }
 0x316   :  { %v876_v9 = vadd.f32 %v990_v5, %v868_v6  ;;  %v1025_v10 = vpop.f32.mrb[15].mxu1 }
 0x318   :  { %v877_v12 = vmax.f32 %v876_v9, 0.0 }
 0x31a   :  { %v885_v13 = vmul.f32 %v991_v11, %v877_v12 }
 0x31c   :  { %v886_v14 = vsel %vm704_vm2, %v885_v13, 0.0 }
 0x31d   :  { %887 = vadd.xlane.f32.xlu0 %v886_v14 }
 0x3aa   :  { %v888_v16 = vpop.xlane.xlu0 %887 }
 0x3ab   :  { %v896_v17 = vadd.f32 %v992_v15, %v888_v16 }
 0x3ad   :  { %898 = vst.msk [vmem:[%s1537_s13] sm:$0xff] %vm897_vm3, %v896_v17 }

</bundles_post_ra>
